<compile_context>
chip_gen: v6e
topology: v6e:2x2x1
jax: 0.10.0
libtpu: 0.0.40
codegen_flags: <defaults>
</compile_context>

<pallas_src>
import math

import jax
import jax.numpy as jnp
from jax.experimental import pallas as pl
from jax.experimental.pallas import tpu as pltpu


_LANE = 128
_SUBLANE = 8


def _round_up(x, m):
    return ((x + m - 1) // m) * m


def _make_dueling_kernel(n_hidden: int):
    """Kernel closed over the (static) number of hidden layers.

    refs = [x, (w_i, b_i) * n_hidden, w_q, b_q, q_out]
    The dueling combine is already folded into (w_q, b_q), so the epilogue is
    just bias-add + store.
    """

    def kernel(*refs):
        x_ref = refs[0]
        idx = 1
        h = x_ref[...].astype(jnp.bfloat16)                  # f32 -> bf16 (VPU, free)
        for _ in range(n_hidden):
            w_ref, b_ref = refs[idx], refs[idx + 1]
            idx += 2
            acc = jnp.dot(h, w_ref[...], preferred_element_type=jnp.float32)
            acc = jnp.maximum(acc + b_ref[...], 0.0)          # f32 bias + ReLU
            h = acc.astype(jnp.bfloat16)                      # back onto the MXU
        wq_ref, bq_ref, q_ref = refs[idx], refs[idx + 1], refs[idx + 2]
        q = jnp.dot(h, wq_ref[...], preferred_element_type=jnp.float32) + bq_ref[...]
        q_ref[...] = q.astype(q_ref.dtype)

    return kernel


def _param_spec(arr):
    """Grid-invariant, whole-array VMEM-resident parameter block.

    The index_map is constant, so the block is never re-fetched; Buffered(1)
    avoids paying 2x VMEM for a buffer that double-buffering can't use.
    """
    nd = arr.ndim
    return pl.BlockSpec(arr.shape, lambda i, _nd=nd: (0,) * _nd,
                        pipeline_mode=pl.Buffered(1))


def _pick_batch_tile(batch):
    """Batch tile for batch > 64: multiple of 8, <= batch, minimizing padding
    waste; on ties prefer >= 2 grid steps (v7x has 2 TCs) then a larger tile."""
    # TODO(synk): sweep tb in {128, 256} on v5e specifically — its single
    # vector-store slot makes the f32 epilogue of a 256-tall accumulator more
    # store/spill prone than on v6e/v7x.
    best_tb, best_key = None, None
    for tb in (64, 128, 256):
        if tb > batch:
            continue
        steps = -(-batch // tb)
        waste = steps * tb - batch
        key = (waste, 0 if steps >= 2 else 1, -tb)
        if best_key is None or key < best_key:
            best_key, best_tb = key, tb
    return best_tb


def _forward_impl(x, params):
    """x: (batch, num_inputs) f32 -> (batch, num_actions) f32."""
    batch, num_inputs = x.shape
    wv, bv = params["value"]          # (H, 1), (1,)
    wa, ba = params["advantage"]      # (H, A), (A,)
    num_actions = wa.shape[1]
    n_hidden = len(params["hidden"])

    # ---- fold the dueling combine into the head (f32, cast to bf16 once) ----
    w_q = wa + wv - jnp.mean(wa, axis=1, keepdims=True)       # (H, A)
    b_q = ba + bv[0] - jnp.mean(ba)                           # (A,)

    # ---- pad parameters to lane-aligned widths (traced once, fuses in jit) --
    flat_args = []
    in_dim = num_inputs                 # first layer contracts over unpadded x
    for (w, b) in params["hidden"]:
        o = w.shape[1]
        o_pad = _round_up(o, _LANE)
        w_p = jnp.zeros((in_dim, o_pad), jnp.float32).at[: w.shape[0], :o].set(w)
        b_p = jnp.zeros((1, o_pad), jnp.float32).at[0, :o].set(b)
        flat_args += [w_p.astype(jnp.bfloat16), b_p]          # weights bf16, bias f32
        in_dim = o_pad

    head_pad = _round_up(num_actions, _LANE)
    w_hp = (jnp.zeros((in_dim, head_pad), jnp.float32)
            .at[: w_q.shape[0], :num_actions].set(w_q))
    b_hp = jnp.zeros((1, head_pad), jnp.float32).at[0, :num_actions].set(b_q)
    flat_args += [w_hp.astype(jnp.bfloat16), b_hp]

    # ---- batch tiling: no padded activation copy for batch > 64 -------------
    if batch <= 64:
        tb = _round_up(batch, _SUBLANE)
        x_in = x if tb == batch else (
            jnp.zeros((tb, num_inputs), x.dtype).at[:batch].set(x))
        n_rows = tb
    else:
        tb = _pick_batch_tile(batch)
        x_in = x                         # unpadded; partial last tile is masked
        n_rows = batch
    grid = (pl.cdiv(n_rows, tb),)

    # ---- explicit VMEM budget (weights single-buffered, tiles double) -------
    resident = sum(math.prod(a.shape) * jnp.dtype(a.dtype).itemsize
                   for a in flat_args)                         # Buffered(1)
    resident += 2 * tb * num_inputs * 4                        # x tile (f32) x2
    resident += 2 * tb * head_pad * 4                          # out tile (f32) x2
    widest = max([num_inputs, head_pad] + [a.shape[1] for a in flat_args[0::2]])
    resident += tb * widest * 6                                # f32 acc + bf16 h
    vmem_limit = int(min(max(resident * 3 // 2 + (4 << 20), 16 << 20), 64 << 20))

    # TODO(synk): if the bf16 weight residency exceeds ~16-24 MiB (binding on
    # v7x: 64 MiB physical, BlockSpec tiles + intermediates on top), switch the
    # large layers to K/N-tiled weight BlockSpecs instead of whole-weight
    # residency; v6e/v5e only need the vmem_limit raise below.
    kernel = _make_dueling_kernel(n_hidden)
    q_full = pl.pallas_call(
        kernel,
        out_shape=jax.ShapeDtypeStruct((n_rows, head_pad), jnp.float32),
        grid=grid,
        in_specs=[pl.BlockSpec((tb, num_inputs), lambda i: (i, 0))]
                 + [_param_spec(a) for a in flat_args],
        out_specs=pl.BlockSpec((tb, head_pad), lambda i: (i, 0)),
        compiler_params=pltpu.CompilerParams(
            dimension_semantics=("parallel",),
            vmem_limit_bytes=vmem_limit),
    )(x_in, *flat_args)

    return q_full[:batch, :num_actions]


_forward_jit = jax.jit(_forward_impl)


def dueling_dqn_forward(x, params):
    """params = {"hidden": [(w, b), ...], "value": (w, b), "advantage": (w, b)}."""
    single_input = x.ndim == 1
    if single_input:
        x = x[None, :]
    q = _forward_jit(x, params)
    return q[0] if single_input else q


def init_params(key, num_inputs, num_actions, hidden_sizes=(128,)):
    """Deterministic init mimicking nn.Linear's uniform(-1/sqrt(fan_in), +...)."""
    params = {"hidden": []}
    in_size = num_inputs
    for next_size in hidden_sizes:
        key, kw, kb = jax.random.split(key, 3)
        bound = 1.0 / float(in_size) ** 0.5
        w = jax.random.uniform(kw, (in_size, next_size), jnp.float32, -bound, bound)
        b = jax.random.uniform(kb, (next_size,), jnp.float32, -bound, bound)
        params["hidden"].append((w, b))
        in_size = next_size
    for name, out_size in (("value", 1), ("advantage", num_actions)):
        key, kw, kb = jax.random.split(key, 3)
        bound = 1.0 / float(in_size) ** 0.5
        w = jax.random.uniform(kw, (in_size, out_size), jnp.float32, -bound, bound)
        b = jax.random.uniform(kb, (out_size,), jnp.float32, -bound, bound)
        params[name] = (w, b)
    return params


def reference_forward_bf16(x, params):
    """Pure-JAX reference matching the kernel's arithmetic exactly: bf16 weights
    on the MXU, f32 accumulation, dueling combine folded into the head in f32
    before a single bf16 cast."""
    single_input = x.ndim == 1
    if single_input:
        x = x[None, :]
    wv, bv = params["value"]
    wa, ba = params["advantage"]
    w_q = (wa + wv - jnp.mean(wa, axis=1, keepdims=True)).astype(jnp.bfloat16)
    b_q = ba + bv[0] - jnp.mean(ba)
    h = x.astype(jnp.bfloat16)
    for w, b in params["hidden"]:
        acc = jnp.dot(h, w.astype(jnp.bfloat16), preferred_element_type=jnp.float32) + b
        h = jnp.maximum(acc, 0.0).astype(jnp.bfloat16)
    q = jnp.dot(h, w_q, preferred_element_type=jnp.float32) + b_q
    if single_input:
        q = q[0]
    return q


def reference_forward_f32(x, params):
    """Full-precision reference of DuelingDQN.forward (sanity check)."""
    single_input = x.ndim == 1
    if single_input:
        x = x[None, :]
    h = x
    for w, b in params["hidden"]:
        h = jax.nn.relu(h @ w + b)
    value = h @ params["value"][0] + params["value"][1]
    adv = h @ params["advantage"][0] + params["advantage"][1]
    q = value + adv - adv.mean(axis=1, keepdims=True)
    if single_input:
        q = q[0]
    return q


if __name__ == "__main__":
    key = jax.random.PRNGKey(0)
    num_inputs, num_actions = 32, 8
    hidden_sizes = (128,)
    batch = 4

    kp, kx = jax.random.split(key)
    params = init_params(kp, num_inputs, num_actions, hidden_sizes)
    x = jax.random.normal(kx, (batch, num_inputs), jnp.float32)

    # small batch (padded-to-8 path)
    q = jax.block_until_ready(dueling_dqn_forward(x, params))
    assert q.shape == (batch, num_actions)
    q_ref = reference_forward_bf16(x, params)
    assert jnp.allclose(q, q_ref, atol=2e-3, rtol=2e-3), "mismatch vs bf16 reference"
    q_f32 = reference_forward_f32(x, params)
    assert jnp.allclose(q, q_f32, atol=1e-1, rtol=1e-1), "mismatch vs f32 reference"

    # 1-D (single state) path, like x.dim() == 1 in PyTorch
    q1 = jax.block_until_ready(dueling_dqn_forward(x[0], params))
    assert q1.shape == (num_actions,)
    assert jnp.allclose(q1, q_ref[0], atol=2e-3, rtol=2e-3)

    # larger batch: exercises the no-copy cdiv grid with a masked partial tile
    kx2 = jax.random.PRNGKey(1)
    x_big = jax.random.normal(kx2, (100, num_inputs), jnp.float32)
    q_big = jax.block_until_ready(dueling_dqn_forward(x_big, params))
    assert q_big.shape == (100, num_actions)
    q_big_ref = reference_forward_bf16(x_big, params)
    assert jnp.allclose(q_big, q_big_ref, atol=2e-3, rtol=2e-3)

    print("KERNEL_OK")
</pallas_src>

<mosaic_0001>
module attributes {stable_mosaic.version = 11 : i64} {
  func.func @kernel(%arg0: i32, %arg1: memref<8x32xf32, #tpu.memory_space<vmem>>, %arg2: memref<32x128xbf16, #tpu.memory_space<vmem>>, %arg3: memref<1x128xf32, #tpu.memory_space<vmem>>, %arg4: memref<128x128xbf16, #tpu.memory_space<vmem>>, %arg5: memref<1x128xf32, #tpu.memory_space<vmem>>, %arg6: memref<8x128xf32, #tpu.memory_space<vmem>>) attributes {dimension_semantics = [#tpu.dimension_semantics<parallel>], iteration_bounds = array<i64: 1>, scalar_prefetch = 0 : i64, scratch_operands = 0 : i64, tpu.core_type = #tpu.core_type<tc>, window_params = [{transform_indices = @transform_0, window_bounds = array<i64: 8, 32>}, {pipeline_mode = #tpu.pipeline_mode<synchronous>, transform_indices = @transform_1, window_bounds = array<i64: 32, 128>}, {pipeline_mode = #tpu.pipeline_mode<synchronous>, transform_indices = @transform_2, window_bounds = array<i64: 1, 128>}, {pipeline_mode = #tpu.pipeline_mode<synchronous>, transform_indices = @transform_3, window_bounds = array<i64: 128, 128>}, {pipeline_mode = #tpu.pipeline_mode<synchronous>, transform_indices = @transform_4, window_bounds = array<i64: 1, 128>}, {transform_indices = @transform_5, window_bounds = array<i64: 8, 128>}]} {
    %c0 = arith.constant 0 : index
    %c0_0 = arith.constant 0 : index
    %0 = vector.load %arg1[%c0, %c0_0] : memref<8x32xf32, #tpu.memory_space<vmem>>, vector<8x32xf32>
    %1 = arith.truncf %0 : vector<8x32xf32> to vector<8x32xbf16>
    %c0_1 = arith.constant 0 : index
    %c0_2 = arith.constant 0 : index
    %2 = vector.load %arg2[%c0_1, %c0_2] : memref<32x128xbf16, #tpu.memory_space<vmem>>, vector<32x128xbf16>
    %cst = arith.constant dense<0.000000e+00> : vector<8x128xf32>
    %3 = tpu.matmul %1, %2, %cst {dimension_numbers = #tpu.dot_dimension_numbers<[1], [0], [0], [1], [0, 0, 1, 1], [], []>} : vector<8x32xbf16>, vector<32x128xbf16>, vector<8x128xf32> -> vector<8x128xf32>
    %c0_3 = arith.constant 0 : index
    %c0_4 = arith.constant 0 : index
    %4 = vector.load %arg3[%c0_3, %c0_4] : memref<1x128xf32, #tpu.memory_space<vmem>>, vector<1x128xf32>
    %5 = vector.broadcast %4 : vector<1x128xf32> to vector<8x128xf32>
    %6 = arith.addf %3, %5 : vector<8x128xf32>
    %cst_5 = arith.constant 0.000000e+00 : f32
    %7 = vector.broadcast %cst_5 : f32 to vector<8x128xf32>
    %8 = arith.maximumf %6, %7 : vector<8x128xf32>
    %9 = arith.truncf %8 : vector<8x128xf32> to vector<8x128xbf16>
    %c0_6 = arith.constant 0 : index
    %c0_7 = arith.constant 0 : index
    %10 = vector.load %arg4[%c0_6, %c0_7] : memref<128x128xbf16, #tpu.memory_space<vmem>>, vector<128x128xbf16>
    %cst_8 = arith.constant dense<0.000000e+00> : vector<8x128xf32>
    %11 = tpu.matmul %9, %10, %cst_8 {dimension_numbers = #tpu.dot_dimension_numbers<[1], [0], [0], [1], [0, 0, 1, 1], [], []>} : vector<8x128xbf16>, vector<128x128xbf16>, vector<8x128xf32> -> vector<8x128xf32>
    %c0_9 = arith.constant 0 : index
    %c0_10 = arith.constant 0 : index
    %12 = vector.load %arg5[%c0_9, %c0_10] : memref<1x128xf32, #tpu.memory_space<vmem>>, vector<1x128xf32>
    %13 = vector.broadcast %12 : vector<1x128xf32> to vector<8x128xf32>
    %14 = arith.addf %11, %13 : vector<8x128xf32>
    %c0_11 = arith.constant 0 : index
    %c0_12 = arith.constant 0 : index
    %15 = vector.load %arg6[%c0_11, %c0_12] : memref<8x128xf32, #tpu.memory_space<vmem>>, vector<8x128xf32>
    tpu.vector_store %arg6[%c0_11, %c0_12], %14 {strides = array<i32>} : memref<8x128xf32, #tpu.memory_space<vmem>>, vector<8x128xf32>,
    return
  }
  func.func @transform_0(%arg0: i32) -> (i32, i32) {
    %c0_i32 = arith.constant 0 : i32
    %c0_i32_0 = arith.constant 0 : i32
    return %arg0, %c0_i32 : i32, i32
  }
  func.func @transform_1(%arg0: i32) -> (i32, i32) {
    %c0_i32 = arith.constant 0 : i32
    %c0_i32_0 = arith.constant 0 : i32
    %c0_i32_1 = arith.constant 0 : i32
    return %c0_i32, %c0_i32_0 : i32, i32
  }
  func.func @transform_2(%arg0: i32) -> (i32, i32) {
    %c0_i32 = arith.constant 0 : i32
    %c0_i32_0 = arith.constant 0 : i32
    %c0_i32_1 = arith.constant 0 : i32
    return %c0_i32, %c0_i32_0 : i32, i32
  }
  func.func @transform_3(%arg0: i32) -> (i32, i32) {
    %c0_i32 = arith.constant 0 : i32
    %c0_i32_0 = arith.constant 0 : i32
    %c0_i32_1 = arith.constant 0 : i32
    return %c0_i32, %c0_i32_0 : i32, i32
  }
  func.func @transform_4(%arg0: i32) -> (i32, i32) {
    %c0_i32 = arith.constant 0 : i32
    %c0_i32_0 = arith.constant 0 : i32
    %c0_i32_1 = arith.constant 0 : i32
    return %c0_i32, %c0_i32_0 : i32, i32
  }
  func.func @transform_5(%arg0: i32) -> (i32, i32) {
    %c0_i32 = arith.constant 0 : i32
    %c0_i32_0 = arith.constant 0 : i32
    return %arg0, %c0_i32 : i32, i32
  }
}

</mosaic_0001>

<bundles_post_ra>
// kernel: _forward_impl.1
= control target key start
LH: loop header
LB: loop body
LE: loop exit
PB: predicated region body
PF: predicated region fallthrough
CT: control target
= control target key end

     0   :  { %v273_v0 = vmov 0.0   ;;  %vm274_vm0 = vmmov 0   ;;  %vm46_vm1 = vcmask 261120   ;;  %s347_s1 = inlined_call_operand.vmem [shape: bf16[32,128], index: 1, kind: input, shape index: {}]   ;;  %s348_s0 = inlined_call_operand.vmem [shape: f32[8,32], index: 0, kind: input, shape index: {}]   ;;  %s349_s3 = inlined_call_operand.vmem [shape: bf16[128,128], index: 3, kind: input, shape index: {}]   ;;  %s350_s2 = inlined_call_operand.vmem [shape: f32[1,128], index: 2, kind: input, shape index: {}]   ;;  %s351_s4 = inlined_call_operand.vmem [shape: f32[1,128], index: 4, kind: input, shape index: {}]   ;;  %s352_s5 = inlined_call_operand.vmem [shape: f32[8,128], index: 5, kind: output, shape index: {}]  }
   0x1   :  { %233 = vmatprep.subr.bf16.mxu0 %v273_v0  ;;  %v263_v1 = vld [vmem:[%s347_s1 + $0x8] sm:$0xff]   ;;  %237 = vmatprep.mubr.msk.bf16.mxu0 %vm274_vm0, %v273_v0  ;;  %v264_v2 = vld [vmem:[%s347_s1] sm:$0xff]   ;;  %v265_v4 = vld [vmem:[%s349_s3 + $0x38] sm:$0xff]  }
   0x2   :  { %241 = vmatprep.subr.bf16.mxu1 %v273_v0  ;;  %257 = vmatprep.mubr.msk.bf16.mxu1 %vm274_vm0, %v273_v0  ;;  %v21_v3 = vld [vmem:[%s348_s0] sm:$0xff]  ;;  %v266_v6 = vld [vmem:[%s349_s3 + $0x30] sm:$0xff]   ;;  %v267_v7 = vld [vmem:[%s349_s3 + $0x28] sm:$0xff]  }
   0x3   :  { %234 = vmatpush3.bf16.msra.mxu0 %v263_v1  ;;  %v22_v5 = vpack.c.bf16 %v21_v3, %v21_v3  ;;  %242 = vmatpush3.bf16.msra.mxu1 %v265_v4  ;;  %v268_v8 = vld [vmem:[%s349_s3 + $0x20] sm:$0xff]   ;;  %v269_v9 = vld [vmem:[%s349_s3 + $0x18] sm:$0xff]   ;;  %v270_v10 = vld [vmem:[%s349_s3 + $0x10] sm:$0xff]  }
   0x4   :  { %235 = vmatprep.subr.bf16.mxu0 %v273_v0  ;;  %243 = vmatprep.subr.bf16.mxu1 %v273_v0  ;;  %v271_v11 = vld [vmem:[%s349_s3 + $0x8] sm:$0xff]   ;;  %v272_v12 = vld [vmem:[%s349_s3] sm:$0xff]  }
   0x5   :  { %v208_v13 = vld [vmem:[%s350_s2] ss:$0 sm:$0xff] }
   0x6   :  { %v212_v21 = vld [vmem:[%s351_s4] ss:$0 sm:$0xff] }
   0x7   :  { %236 = vmatpush3.bf16.msra.mxu0 %v264_v2  ;;  %244 = vmatpush3.bf16.msra.mxu1 %v266_v6 }
   0x8   :  { %245 = vmatprep.subr.bf16.mxu1 %v273_v0 }
   0xa   :  { %238 = vmatmul.mubr.msk.bf16.vlgmr.msra.gmra.mxu0 %vm46_vm1, %v22_v5 }
   0xb   :  { %246 = vmatpush3.bf16.msra.mxu1 %v267_v7 }
   0xc   :  { %247 = vmatprep.subr.bf16.mxu1 %v273_v0 }
   0xf   :  { %248 = vmatpush3.bf16.msra.mxu1 %v268_v8 }
  0x10   :  { %249 = vmatprep.subr.bf16.mxu1 %v273_v0 }
  0x13   :  { %250 = vmatpush3.bf16.msra.mxu1 %v269_v9 }
  0x14   :  { %251 = vmatprep.subr.bf16.mxu1 %v273_v0 }
  0x17   :  { %252 = vmatpush3.bf16.msra.mxu1 %v270_v10 }
  0x18   :  { %253 = vmatprep.subr.bf16.mxu1 %v273_v0 }
  0x1b   :  { %254 = vmatpush3.bf16.msra.mxu1 %v271_v11 }
  0x1c   :  { %255 = vmatprep.subr.bf16.mxu1 %v273_v0 }
  0x1f   :  { %256 = vmatpush3.bf16.msra.mxu1 %v272_v12 }
  0xca   :  { %v84_v14 = vpop.f32.mrf.mxu0 }
  0xcb   :  { %v85_v15 = vadd.f32 %v208_v13, %v84_v14 }
  0xcc   :  { %v239_v16 = vpop.f32.mrf.mxu0 }
  0xcd   :  { %v90_v17 = vmax.f32 %v85_v15, 0.0 }
  0xce   :  { %v87_v18 = vpop.f32.mrf.mxu0 }
  0xcf   :  { %v91_v19 = vpack.c.bf16 %v90_v17, %v90_v17 }
  0xd0   :  { %v240_v20 = vpop.f32.mrf.mxu0 }
  0xd1   :  { %258 = vmatmul.mubr.bf16.vlgmr.msra.gmra.mxu1 %v91_v19 }
 0x191   :  { %v197_v22 = vpop.f32.mrf.mxu1 }
 0x192   :  { %v198_v23 = vadd.f32 %v212_v21, %v197_v22 }
 0x193   :  { %v259_v24 = vpop.f32.mrf.mxu1 }
 0x194   :  { %203 = vst [vmem:[%s352_s5] sm:$0xff] %v198_v23 }
 0x195   :  { %v200_v25 = vpop.f32.mrf.mxu1 }
 0x197   :  { %v260_v26 = vpop.f32.mrf.mxu1 }

</bundles_post_ra>
